<compile_context>
chip_gen: v6e
topology: v6e:2x2x1
jax: 0.10.0
libtpu: 0.0.40
codegen_flags: <defaults>
</compile_context>

<pallas_src>
import functools
import math

import jax
import jax.numpy as jnp
from jax.experimental import pallas as pl
from jax.experimental.pallas import tpu as pltpu


# ----------------------------------------------------------------------------
# Helpers
# ----------------------------------------------------------------------------
def _round_up(x, m):
    return -(-x // m) * m


def _vmem_limit_bytes():
    """Per-generation VMEM budget: ~3/4 of physical, capped."""
    try:
        cap = pltpu.get_tpu_info().vmem_capacity_bytes
        return int(min(cap * 3 // 4, 96 * 1024 * 1024))
    except Exception:
        return 48 * 1024 * 1024          # conservative (v7x-sized) fallback


def _vmem_budget():
    # headroom for pipeline state / semaphores / compiler scratch
    return _vmem_limit_bytes() * 2 // 3


def _compiler_params(dimension_semantics):
    return pltpu.CompilerParams(dimension_semantics=dimension_semantics,
                                vmem_limit_bytes=_vmem_limit_bytes())


def _copy_probe_kernel(x_ref, o_ref):
    o_ref[...] = x_ref[...]


@functools.lru_cache(maxsize=None)
def _single_buffering_supported():
    """Feature-probe pipeline_mode=pl.Buffered(1) on a tiny kernel."""
    try:
        fn = pl.pallas_call(
            _copy_probe_kernel,
            out_shape=jax.ShapeDtypeStruct((16, 128), jnp.float32),
            grid=(2,),
            in_specs=[pl.BlockSpec((8, 128), lambda i: (0, 0),
                                   pipeline_mode=pl.Buffered(1))],
            out_specs=pl.BlockSpec((8, 128), lambda i: (i, 0)),
        )
        jax.block_until_ready(fn(jnp.zeros((8, 128), jnp.float32)))
        return True
    except Exception:
        return False


def _const_block_spec(block_shape, index_map):
    """BlockSpec for a block whose index never changes over the grid.

    Single-buffered when supported: default double-buffering would keep a full
    extra copy of every constant weight block (e.g. 2 x 8 MiB W_hh at dim=1024
    bf16) — VMEM better spent on larger activation tiles (critical on v7x).
    """
    if _single_buffering_supported():
        return pl.BlockSpec(block_shape, index_map, pipeline_mode=pl.Buffered(1))
    return pl.BlockSpec(block_shape, index_map)


def _pick_col_tile(out_dim, k_total, in_bytes, budget):
    """Lane tile for the projection: multiple-of-128 divisor of out_dim."""
    if out_dim % 128 != 0:
        return out_dim                      # must then be the full lane extent
    tn = out_dim
    # keep the (k_total, tn) weight slab (double-buffered) within ~half the budget
    while tn > 128 and 2 * k_total * tn * in_bytes > budget // 2:
        cand = [d for d in range(tn - 128, 127, -128) if out_dim % d == 0]
        if not cand:
            break
        tn = cand[0]
    return tn


def _pick_row_tile(n_rows, k_total, tn, in_bytes, out_bytes, budget):
    """Sublane tile from the VMEM budget; >= 2 tiles when rows allow (megacore)."""
    fixed = 2 * k_total * tn * in_bytes + 2 * tn * 4            # weights + bias
    per_row = 2 * (k_total * in_bytes + tn * out_bytes)          # x blocks + out
    avail = max(budget - fixed, 8 * per_row)
    cap = max(8, min(1024, avail // per_row))
    cap = (cap // 8) * 8
    if n_rows > 8:                     # keep >= 2 row tiles so the "parallel"
        half = _round_up((n_rows + 1) // 2, 8)   # axis can span both v7x cores
        cap = min(cap, max(8, half))
    return max(8, min(cap, _round_up(n_rows, 8)))


def _pick_time_block(t, batch, cap=32):
    """Timesteps per grid step; t_blk*batch is kept a multiple of 8."""
    step = 8 // math.gcd(batch, 8)
    cap = max(step, min(_round_up(cap, step), _round_up(t, step)))
    for tb in range(cap, 0, -step):        # prefer an exact divisor (no padding)
        if t % tb == 0:
            return tb
    return cap                             # caller pads T up to a multiple


# ----------------------------------------------------------------------------
# Projection kernel: out = sum_k x_k @ w_k + b  (row/column tiled)
# ----------------------------------------------------------------------------
def _fma_kernel(*refs):
    *xw_refs, b_ref, o_ref = refs
    acc = None
    for i in range(len(xw_refs) // 2):
        p = jnp.dot(xw_refs[2 * i][...], xw_refs[2 * i + 1][...],
                    preferred_element_type=jnp.float32)
        acc = p if acc is None else acc + p
    o_ref[...] = (acc + b_ref[...].astype(jnp.float32)).astype(o_ref.dtype)


def _fused_linear(xs_and_ws, bias, out_dim, out_dtype):
    """out[N, out_dim] = sum_k xs[k] @ ws[k] + bias, tiled over rows and columns."""
    n_rows = xs_and_ws[0][0].shape[0]
    k_total = sum(x.shape[1] for x, _ in xs_and_ws)
    in_bytes = jnp.dtype(xs_and_ws[0][0].dtype).itemsize
    out_bytes = jnp.dtype(out_dtype).itemsize
    budget = _vmem_budget()

    tn = _pick_col_tile(out_dim, k_total, in_bytes, budget)
    tm = _pick_row_tile(n_rows, k_total, tn, in_bytes, out_bytes, budget)
    n_col = out_dim // tn
    n_row = pl.cdiv(n_rows, tm)
    pad = n_row * tm - n_rows

    operands, in_specs = [], []
    for x, w in xs_and_ws:
        k = x.shape[1]
        if pad:
            x = jnp.pad(x, ((0, pad), (0, 0)))
        operands.append(x)
        in_specs.append(pl.BlockSpec((tm, k), lambda c, r: (r, 0)))
        operands.append(w)
        if n_col == 1:                       # weight index constant over the grid
            in_specs.append(_const_block_spec((k, tn), lambda c, r: (0, c)))
        else:
            in_specs.append(pl.BlockSpec((k, tn), lambda c, r: (0, c)))
    operands.append(bias)
    in_specs.append(pl.BlockSpec((1, tn), lambda c, r: (0, c)))

    out = pl.pallas_call(
        _fma_kernel,
        out_shape=jax.ShapeDtypeStruct((n_row * tm, out_dim), out_dtype),
        grid=(n_col, n_row),                 # columns outer: weight blocks change rarely
        in_specs=in_specs,
        out_specs=pl.BlockSpec((tm, tn), lambda c, r: (r, c)),
        compiler_params=_compiler_params(("parallel", "parallel")),
    )(*operands)
    return out[:n_rows] if pad else out


# ----------------------------------------------------------------------------
# Fused bidirectional LSTM recurrence
# ----------------------------------------------------------------------------
def _sigmoid(x):
    # One EUP push (tanh) instead of exp + reciprocal.
    return 0.5 * jnp.tanh(0.5 * x) + 0.5


def _bilstm_kernel(pre_f_ref, pre_b_ref, whh_f_ref, whh_b_ref,
                   out_f_ref, out_b_ref,
                   h_f_sc, c_f_sc, h_b_sc, c_b_sc,
                   *, dim, batch, t_block, group, unroll):
    """Both LSTM directions over one block of timesteps (2-D time-major rows).

    pre_*_ref : (t_block*batch, 4*dim) precomputed x @ W_ih + b rows (forward /
                reversed-block backward), rows t*batch .. t*batch+batch.
    whh_*_ref : (dim, 4*dim) recurrent weights, constant over the grid.
    out_*_ref : (t_block*batch, dim) hidden outputs.
    *_sc      : (batch, dim) f32 h/c state, persistent across grid steps.
    """
    @pl.when(pl.program_id(0) == 0)
    def _init():
        for sc in (h_f_sc, c_f_sc, h_b_sc, c_b_sc):
            sc[...] = jnp.zeros_like(sc)

    whh_f = whh_f_ref[...]                    # resident for the whole time block
    whh_b = whh_b_ref[...]
    grp_rows = group * batch                  # multiple of 8: aligned loads/stores
    n_groups = t_block // group

    def cell(pre, h, c, whh):
        # bf16 (or f32) MXU inputs, f32 accumulation, f32 gate math / state.
        g = pre.astype(jnp.float32) + jnp.dot(
            h.astype(whh.dtype), whh, preferred_element_type=jnp.float32)
        i_g = _sigmoid(g[:, 0 * dim:1 * dim])
        f_g = _sigmoid(g[:, 1 * dim:2 * dim])
        g_g = jnp.tanh(g[:, 2 * dim:3 * dim])
        o_g = _sigmoid(g[:, 3 * dim:4 * dim])
        c_new = f_g * c + i_g * g_g
        h_new = o_g * jnp.tanh(c_new)
        return h_new, c_new

    # TODO(synk): on v6e/v7x with dim <= 128 the two directions' recurrent
    # matmuls could be fused into one block-diagonal matmul (K: dim -> 2*dim)
    # to fill the 256-deep MXU; skipped since demucs uses dim >> 128.
    def run_group(rows, h, c, whh, pre_ref, out_ref, reverse):
        pre_blk = pre_ref[pl.ds(rows, grp_rows), :]     # aligned (8k, 4*dim) load
        outs = [None] * group
        steps = range(group - 1, -1, -1) if reverse else range(group)
        for tt in steps:                                 # static in-group unroll
            h, c = cell(pre_blk[tt * batch:(tt + 1) * batch], h, c, whh)
            outs[tt] = h.astype(out_ref.dtype)
        out_blk = outs[0] if group == 1 else jnp.concatenate(outs, axis=0)
        out_ref[pl.ds(rows, grp_rows), :] = out_blk      # aligned, unmasked store
        return h, c

    def body(gi, carry):
        h_f, c_f, h_b, c_b = carry
        rows_f = pl.multiple_of(gi * grp_rows, grp_rows)
        rows_b = pl.multiple_of((n_groups - 1 - gi) * grp_rows, grp_rows)
        # Two independent chains in one loop body: the scheduler hides one
        # chain's MXU/EUP latency behind the other's VPU/gate work.
        h_f, c_f = run_group(rows_f, h_f, c_f, whh_f, pre_f_ref, out_f_ref, False)
        h_b, c_b = run_group(rows_b, h_b, c_b, whh_b, pre_b_ref, out_b_ref, True)
        return h_f, c_f, h_b, c_b

    carry = (h_f_sc[...], c_f_sc[...], h_b_sc[...], c_b_sc[...])
    # Bounded unroll: full unrolling of 32 steps x 2 directions spills vregs
    # at large dim; partial unroll keeps LLO visibility without spills.
    h_f, c_f, h_b, c_b = jax.lax.fori_loop(0, n_groups, body, carry, unroll=unroll)
    h_f_sc[...] = h_f
    c_f_sc[...] = c_f
    h_b_sc[...] = h_b
    c_b_sc[...] = c_b


def _bilstm(pre_f, pre_b, whh_f_t, whh_b_t, *, dim, batch, out_dtype):
    """Run both LSTM directions in one sequential pallas_call. Returns (h_f, h_b).

    pre_f / pre_b: (T*batch, 4*dim), time-major rows, forward time order.
    """
    n_rows = pre_f.shape[0]
    t = n_rows // batch
    g = 8 // math.gcd(batch, 8)               # timesteps per aligned row group
    t_blk = _pick_time_block(t, batch)        # multiple of g by construction
    nb = pl.cdiv(t, t_blk)
    pad_rows = (nb * t_blk - t) * batch
    if pad_rows:
        # Forward pads at the end of time, backward at the beginning, so padded
        # steps are only visited after all real steps of that direction.
        pre_f = jnp.pad(pre_f, ((0, pad_rows), (0, 0)))
        pre_b = jnp.pad(pre_b, ((pad_rows, 0), (0, 0)))

    blk_rows = t_blk * batch
    fwd_idx = lambda s: (s, 0)
    bwd_idx = lambda s: (nb - 1 - s, 0)
    const_idx = lambda s: (0, 0)
    base_unroll = 8 if dim <= 256 else 4
    unroll = max(1, min(t_blk // g, base_unroll // g))

    # TODO(synk): on v7x (2 TensorCores) the two directions could be split
    # across cores via a leading size-2 "parallel"/CORE_PARALLEL grid axis;
    # kept fused here because interleaving the two independent chains in one
    # loop is what hides MXU/EUP latency on single-core v5e/v6e.
    out_f, out_b = pl.pallas_call(
        functools.partial(_bilstm_kernel, dim=dim, batch=batch,
                          t_block=t_blk, group=g, unroll=unroll),
        out_shape=(jax.ShapeDtypeStruct((n_rows + pad_rows, dim), out_dtype),
                   jax.ShapeDtypeStruct((n_rows + pad_rows, dim), out_dtype)),
        grid=(nb,),
        in_specs=[
            pl.BlockSpec((blk_rows, 4 * dim), fwd_idx),    # pre, forward order
            pl.BlockSpec((blk_rows, 4 * dim), bwd_idx),    # pre, reversed blocks
            _const_block_spec((dim, 4 * dim), const_idx),  # W_hh forward
            _const_block_spec((dim, 4 * dim), const_idx),  # W_hh backward
        ],
        out_specs=(pl.BlockSpec((blk_rows, dim), fwd_idx),
                   pl.BlockSpec((blk_rows, dim), bwd_idx)),
        scratch_shapes=[pltpu.VMEM((batch, dim), jnp.float32) for _ in range(4)],
        compiler_params=_compiler_params(("arbitrary",)),   # sequential recurrence
    )(pre_f, pre_b, whh_f_t, whh_b_t)

    if pad_rows:
        out_f = out_f[:n_rows]
        out_b = out_b[pad_rows:]
    return out_f, out_b


# ----------------------------------------------------------------------------
# Forward wrapper
# ----------------------------------------------------------------------------
def blstm_forward(x, params, *, dim, layers=1, compute_dtype=jnp.bfloat16):
    """BLSTM forward. x: (B, C=dim, T) float32 -> (B, dim, T) float32.

    compute_dtype is the MXU / inter-kernel HBM-stream dtype (x, weights, pre,
    hidden outputs); accumulation, gate math and h/c state stay float32.
    """
    B, C, T = x.shape
    assert C == dim
    # (B, C, T) -> (T, B, C) -> dense time-major 2-D rows (T*B, dim); with small
    # B this keeps the sublane axis full instead of padding B up to 8.
    # TODO(synk): fold this transpose into the projection kernel (BlockSpec over
    # (B, C, t-slab) contracting C) to avoid the standalone HBM round trip.
    seq = jnp.transpose(x, (2, 0, 1)).reshape(T * B, dim).astype(compute_dtype)

    feats = [seq]                               # layer input as (T*B, k) pieces
    for l in range(layers):
        pre = {}
        for tag in ("fwd", "bwd"):
            p = params[f"l{l}_{tag}"]
            wih_t = p["wih_t"].astype(compute_dtype)            # (sum_k, 4*dim)
            xs_and_ws, off = [], 0
            for f2d in feats:
                k = f2d.shape[1]
                xs_and_ws.append((f2d, wih_t[off:off + k]))
                off += k
            # Input projection for ALL timesteps in one tiled MXU matmul,
            # emitted in compute_dtype (bf16 by default) to halve the dominant
            # HBM stream feeding the recurrence.
            pre[tag] = _fused_linear(xs_and_ws, p["b"], 4 * dim, compute_dtype)
        h_f, h_b = _bilstm(
            pre["fwd"], pre["bwd"],
            params[f"l{l}_fwd"]["whh_t"].astype(compute_dtype),
            params[f"l{l}_bwd"]["whh_t"].astype(compute_dtype),
            dim=dim, batch=B, out_dtype=compute_dtype)
        feats = [h_f, h_b]

    # Final Linear(2*dim, dim) without materializing the direction concat; f32 out.
    lin_w_t = params["lin_w_t"].astype(compute_dtype)           # (2*dim, dim)
    out2d = _fused_linear([(feats[0], lin_w_t[:dim]), (feats[1], lin_w_t[dim:])],
                          params["lin_b"], dim, jnp.float32)
    return jnp.transpose(out2d.reshape(T, B, dim), (1, 2, 0))   # (B, dim, T)


# ----------------------------------------------------------------------------
# Pure-JAX reference (correctness verification)
# ----------------------------------------------------------------------------
_PREC = jax.lax.Precision.HIGHEST


def _lstm_dir_ref(x_seq, wih_t, whh_t, bias, reverse):
    T, B, _ = x_seq.shape
    dim = whh_t.shape[0]

    def step(carry, xt):
        h, c = carry
        gates = (jnp.dot(xt, wih_t, precision=_PREC)
                 + jnp.dot(h, whh_t, precision=_PREC) + bias)
        i, f, g, o = jnp.split(gates, 4, axis=-1)
        i = jax.nn.sigmoid(i)
        f = jax.nn.sigmoid(f)
        g = jnp.tanh(g)
        o = jax.nn.sigmoid(o)
        c = f * c + i * g
        h = o * jnp.tanh(c)
        return (h, c), h

    init = (jnp.zeros((B, dim), jnp.float32), jnp.zeros((B, dim), jnp.float32))
    xs = x_seq[::-1] if reverse else x_seq
    _, hs = jax.lax.scan(step, init, xs)
    return hs[::-1] if reverse else hs


def blstm_ref(x, params, *, dim, layers=1):
    seq = jnp.transpose(x, (2, 0, 1))
    inp = seq
    for l in range(layers):
        p_f = params[f"l{l}_fwd"]
        p_b = params[f"l{l}_bwd"]
        h_f = _lstm_dir_ref(inp, p_f["wih_t"], p_f["whh_t"], p_f["b"], False)
        h_b = _lstm_dir_ref(inp, p_b["wih_t"], p_b["whh_t"], p_b["b"], True)
        inp = jnp.concatenate([h_f, h_b], axis=-1)
    out = jnp.dot(inp, params["lin_w_t"], precision=_PREC) + params["lin_b"]
    return jnp.transpose(out, (1, 2, 0))


# ----------------------------------------------------------------------------
# Parameter init (matches nn.LSTM / nn.Linear shapes; uniform(-1/sqrt(dim), ..))
# ----------------------------------------------------------------------------
def init_params(key, dim, layers=1):
    stdv = 1.0 / math.sqrt(dim)
    params = {}

    def u(k, shape, s):
        return jax.random.uniform(k, shape, jnp.float32, -s, s)

    for l in range(layers):
        in_dim = dim if l == 0 else 2 * dim
        for tag in ("fwd", "bwd"):
            key, k1, k2, k3, k4 = jax.random.split(key, 5)
            wih = u(k1, (4 * dim, in_dim), stdv)   # PyTorch weight_ih_l{l}(_reverse)
            whh = u(k2, (4 * dim, dim), stdv)      # PyTorch weight_hh_l{l}(_reverse)
            bih = u(k3, (4 * dim,), stdv)
            bhh = u(k4, (4 * dim,), stdv)
            params[f"l{l}_{tag}"] = {
                "wih_t": wih.T,                           # (in_dim, 4*dim)
                "whh_t": whh.T,                           # (dim, 4*dim)
                "b": (bih + bhh).reshape(1, 4 * dim),     # (1, 4*dim)
            }

    key, k1, k2 = jax.random.split(key, 3)
    lin_stdv = 1.0 / math.sqrt(2 * dim)
    lin_w = u(k1, (dim, 2 * dim), lin_stdv)
    lin_b = u(k2, (dim,), lin_stdv)
    params["lin_w_t"] = lin_w.T                 # (2*dim, dim)
    params["lin_b"] = lin_b.reshape(1, dim)     # (1, dim)
    return params


# ----------------------------------------------------------------------------
if __name__ == "__main__":
    B, dim, T = 2, 128, 16     # lane-aligned hidden size; small T/B for the demo
    layers = 2                 # exercises the stacked-layer (2*dim input) path

    key = jax.random.PRNGKey(0)
    key, kx = jax.random.split(key)
    x = jax.random.normal(kx, (B, dim, T), jnp.float32)   # (B, C, T) as in demucs
    params = init_params(key, dim, layers)

    ref = jax.block_until_ready(blstm_ref(x, params, dim=dim, layers=layers))

    # f32 compute path — tight check against the pure-JAX reference.
    out_f32 = jax.block_until_ready(
        blstm_forward(x, params, dim=dim, layers=layers, compute_dtype=jnp.float32))
    assert out_f32.shape == (B, dim, T), out_f32.shape
    err = float(jnp.max(jnp.abs(out_f32 - ref)))
    assert err < 1e-3, f"f32 mismatch: {err}"

    # Default path: bf16 MXU inputs / HBM streams, f32 accumulation + h/c state.
    out = jax.block_until_ready(blstm_forward(x, params, dim=dim, layers=layers))
    assert out.shape == (B, dim, T), out.shape
    err_bf16 = float(jnp.max(jnp.abs(out - ref)))
    assert err_bf16 < 2e-1, f"bf16 mismatch: {err_bf16}"

    print("KERNEL_OK")
</pallas_src>

<mosaic_0001>
module attributes {stable_mosaic.version = 11 : i64} {
  func.func @_copy_probe_kernel(%arg0: i32, %arg1: memref<8x128xf32, #tpu.memory_space<vmem>>, %arg2: memref<8x128xf32, #tpu.memory_space<vmem>>) attributes {dimension_semantics = [#tpu.dimension_semantics<arbitrary>], iteration_bounds = array<i64: 2>, scalar_prefetch = 0 : i64, scratch_operands = 0 : i64, tpu.core_type = #tpu.core_type<tc>, window_params = [{pipeline_mode = #tpu.pipeline_mode<synchronous>, transform_indices = @transform_0, window_bounds = array<i64: 8, 128>}, {transform_indices = @transform_1, window_bounds = array<i64: 8, 128>}]} {
    %c0 = arith.constant 0 : index
    %c0_0 = arith.constant 0 : index
    %0 = vector.load %arg1[%c0, %c0_0] : memref<8x128xf32, #tpu.memory_space<vmem>>, vector<8x128xf32>
    %c0_1 = arith.constant 0 : index
    %c0_2 = arith.constant 0 : index
    %1 = vector.load %arg2[%c0_1, %c0_2] : memref<8x128xf32, #tpu.memory_space<vmem>>, vector<8x128xf32>
    tpu.vector_store %arg2[%c0_1, %c0_2], %0 {strides = array<i32>} : memref<8x128xf32, #tpu.memory_space<vmem>>, vector<8x128xf32>,
    return
  }
  func.func @transform_0(%arg0: i32) -> (i32, i32) {
    %c0_i32 = arith.constant 0 : i32
    %c0_i32_0 = arith.constant 0 : i32
    %c0_i32_1 = arith.constant 0 : i32
    return %c0_i32, %c0_i32_0 : i32, i32
  }
  func.func @transform_1(%arg0: i32) -> (i32, i32) {
    %c0_i32 = arith.constant 0 : i32
    %c0_i32_0 = arith.constant 0 : i32
    return %arg0, %c0_i32 : i32, i32
  }
}

module attributes {stable_mosaic.version = 11 : i64} {
  func.func @_fma_kernel(%arg0: i32, %arg1: i32, %arg2: memref<16x128xf32, #tpu.memory_space<vmem>>, %arg3: memref<128x512xf32, #tpu.memory_space<vmem>>, %arg4: memref<1x512xf32, #tpu.memory_space<vmem>>, %arg5: memref<16x512xf32, #tpu.memory_space<vmem>>) attributes {dimension_semantics = [#tpu.dimension_semantics<parallel>, #tpu.dimension_semantics<parallel>], iteration_bounds = array<i64: 1, 2>, scalar_prefetch = 0 : i64, scratch_operands = 0 : i64, tpu.core_type = #tpu.core_type<tc>, window_params = [{transform_indices = @transform_0, window_bounds = array<i64: 16, 128>}, {transform_indices = @transform_1, window_bounds = array<i64: 128, 512>}, {transform_indices = @transform_2, window_bounds = array<i64: 1, 512>}, {transform_indices = @transform_3, window_bounds = array<i64: 16, 512>}]} {
    %c0 = arith.constant 0 : index
    %c0_0 = arith.constant 0 : index
    %0 = vector.load %arg2[%c0, %c0_0] : memref<16x128xf32, #tpu.memory_space<vmem>>, vector<16x128xf32>
    %c0_1 = arith.constant 0 : index
    %c0_2 = arith.constant 0 : index
    %1 = vector.load %arg3[%c0_1, %c0_2] : memref<128x512xf32, #tpu.memory_space<vmem>>, vector<128x512xf32>
    %cst = arith.constant dense<0.000000e+00> : vector<16x512xf32>
    %2 = tpu.matmul %0, %1, %cst {dimension_numbers = #tpu.dot_dimension_numbers<[1], [0], [0], [1], [0, 0, 1, 1], [], []>} : vector<16x128xf32>, vector<128x512xf32>, vector<16x512xf32> -> vector<16x512xf32>
    %c0_3 = arith.constant 0 : index
    %c0_4 = arith.constant 0 : index
    %3 = vector.load %arg4[%c0_3, %c0_4] : memref<1x512xf32, #tpu.memory_space<vmem>>, vector<1x512xf32>
    %4 = vector.broadcast %3 : vector<1x512xf32> to vector<16x512xf32>
    %5 = arith.addf %2, %4 : vector<16x512xf32>
    %c0_5 = arith.constant 0 : index
    %c0_6 = arith.constant 0 : index
    %6 = vector.load %arg5[%c0_5, %c0_6] : memref<16x512xf32, #tpu.memory_space<vmem>>, vector<16x512xf32>
    tpu.vector_store %arg5[%c0_5, %c0_6], %5 {strides = array<i32>} : memref<16x512xf32, #tpu.memory_space<vmem>>, vector<16x512xf32>,
    return
  }
  func.func @transform_0(%arg0: i32, %arg1: i32) -> (i32, i32) {
    %c0_i32 = arith.constant 0 : i32
    %c0_i32_0 = arith.constant 0 : i32
    return %arg1, %c0_i32 : i32, i32
  }
  func.func @transform_1(%arg0: i32, %arg1: i32) -> (i32, i32) {
    %c0_i32 = arith.constant 0 : i32
    %c0_i32_0 = arith.constant 0 : i32
    return %c0_i32, %arg0 : i32, i32
  }
  func.func @transform_2(%arg0: i32, %arg1: i32) -> (i32, i32) {
    %c0_i32 = arith.constant 0 : i32
    %c0_i32_0 = arith.constant 0 : i32
    return %c0_i32, %arg0 : i32, i32
  }
  func.func @transform_3(%arg0: i32, %arg1: i32) -> (i32, i32) {
    %c0_i32 = arith.constant 0 : i32
    return %arg1, %arg0 : i32, i32
  }
}

</mosaic_0001>

<bundles_post_ra>
// kernel: tpu_custom_call.1
= control target key start
LH: loop header
LB: loop body
LE: loop exit
PB: predicated region body
PF: predicated region fallthrough
CT: control target
= control target key end

     0   :  { %6 = vsyncpa [#allocation3], 0  ;;  %s453_s0 = inlined_call_operand.hbm [shape: f32[8,128], index: 0, kind: input, shape index: {}]   ;;  %s454_s1 = inlined_call_operand.hbm [shape: f32[16,128], index: 1, kind: output, shape index: {}]  }
   0x1   :  { %7 = vsyncpa [#allocation4], 0 }
   0x2   :  { %9 = vsyncpa [#allocation4 + $0x1], 0  ;;  %s347_s6 = smov 0   ;;  %s349_s7 = smov 0  }
   0x3   :  { %s351_s8 = smov 0   ;;  %s353_s9 = smov 0  }
   0x4 LB: > { %s368_s10 = sadd.s32 4294967295, %s333_s9   ;;  %s183_s11 = sadd.s32 4294967294, %s333_s9   ;;  %s333_s9 = sphi %s353_s9, %s462_s9   ;;  %s329_s8 = sphi %s351_s8, %s461_s8   ;;  %s325_s7 = sphi %s349_s7, %s460_s7   ;;  %s321_s6 = sphi %s347_s6, %s459_s6  }
   0x5   : > { %s372_s12 = sadd.s32 1, %s333_s9   ;;  %s43_s13 = sadd.s32 1, %s329_s8 }
   0x6   : > { %s40_s14 = ssub.s32 %s333_s9, %s372_s12  ;;  %p53_p0 = scmp.ne.s32.totalorder %s329_s8, %s325_s7 }
   0x7   : > { %p41_p1 = scmp.eq.s32.totalorder %s40_s14, 0  ;;  %p54_p2 = scmp.eq.s32.totalorder %s368_s10, 1 }
   0x8   : > { %p59_p3 = scmp.ne.s32.totalorder %s325_s7, %s321_s6  ;;  %p60_p4 = scmp.eq.s32.totalorder %s183_s11, 1 }
   0x9   : > { %s383_s15 = scalar_select %p41_p1, %s329_s8, %s43_s13  }
   0xa   : > { %p385_p5 = por %p54_p2, %p53_p0  ;;  %p389_p6 = por %p60_p4, %p59_p3 }
   0xb   : > { %p184_p7 = scmp.ge.s32.totalorder %s333_s9, 1  ;;  %p67_p8 = scmp.lt.s32.totalorder %s333_s9, 3 }
   0xc   : > { %s456_s17 = scalar_select %p389_p6, 1, 0 }
   0xd   : > { %p207_p9 = scmp.eq.s32.totalorder %s368_s10, 0  ;;  %p396_p10 = pnand %p184_p7, %p67_p8 }
   0xe   : > { %s335_s19 = smov [#allocation2]  }
   0xf   : > { %s80_s20 = sshll.u32 %s335_s19, 4  ;;  %p199_p11 = pneg %p396_p10  ;;  %s81_s20 = int_to_ptr.vmem [resolvable:$true] %s80_s20 }
  0x10   : > { %s254_s21 = scalar_lea.vmem %s81_s20, 128  ;;  %p262_p3 = scmp.lt.s32.totalorder %s81_s20, %s81_s20 }
  0x11   : > { %p200_p12 = pnand %p207_p9, %p199_p11  ;;  %p255_p0 = scmp.ne.s32.totalorder %s81_s20, %s254_s21 }
  0x12   : > { %p263_p4 = scmp.lt.s32.totalorder %s254_s21, %s254_s21 }
  0x13   : > { %p245_p13 = pneg %p200_p12 }
  0x14   : > { %p264_p6 = por %p263_p4, %p262_p3 }
  0x15   : > { %p257_p1 = pnand %p255_p0, %p245_p13 }
  0x17   : > { %p258_p2 = pneg %p257_p1 }
  0x19   : > { %p265_p7 = pnand %p264_p6, %p258_p2 }
  0x1b   : > { %268 = shalt.err (!%p265_p7)
}
  0x1c   : > { %202 = dma.hbm_to_vmem [thread:$0]  (!%p200_p12), %s453_s0, 128, %s81_s20, [#allocation3]  }
  0x1d   : > { %93 = sbr.rel (%p396_p10) target bundleno = 60 (0x3c), region = 24 }
  0x22   : > { %312 = dma.done.wait (%p207_p9), [#allocation3], 128  }
  0x23   : > { %314 = vsyncadd (%p207_p9), [#allocation3], 4294967168  ;;  %s105_s24 = sand.u32 1, %s325_s7   ;;  %s190_s28 = sshll.u32 %s368_s10, 7  ;;  %v108_v0 = vld [vmem:[#allocation2] sm:$0xff] }
  0x24   : > { %s188_s25 = sshll.u32 %s105_s24, 3  ;;  %s122_s2 = scalar_lea.hbm %s454_s1, %s190_s28 }
  0x25   : > { %s107_s26 = scalar_lea.vmem [#allocation5], %s188_s25  ;;  %s111_s3 = scalar_lea.sflag [#allocation4], %s105_s24 }
  0x26   : > { %s124_s27 = sshll.u32 %s107_s26, 4  ;;  %109 = vst [vmem:[%s107_s26] sm:$0xff] %v108_v0  ;;  %s336_s5 = smov [#allocation5]   ;;  %s415_s27 = int_to_ptr.vmem [resolvable:$true] %s124_s27 }
  0x27   : > { %s269_s4 = scalar_lea.vmem %s415_s27, 128  ;;  %s273_s11 = sshll.u32 %s336_s5, 4  ;;  %s274_s11 = int_to_ptr.vmem [resolvable:$false] %s273_s11 }
  0x28   : > { %p270_p6 = scmp.ne.s32.totalorder %s415_s27, %s269_s4  ;;  %s275_s10 = scalar_lea.vmem %s274_s11, 256 }
  0x29   : > { %p276_p10 = scmp.lt.s32.totalorder %s415_s27, %s274_s11  ;;  %p277_p11 = scmp.lt.s32.totalorder %s275_s10, %s269_s4 }
  0x2a   : > { %p271_p8 = pnand %p270_p6, %p385_p5 }
  0x2b   : > { %p278_p12 = por %p277_p11, %p276_p10 }
  0x2c   : > { %p272_p9 = pneg %p271_p8 }
  0x2e   : > { %p279_p13 = pnand %p278_p12, %p272_p9 }
  0x30   : > { %282 = shalt.err (!%p279_p13)
}
  0x31   : > { %s283_s13 = scalar_lea.hbm %s122_s2, 128  ;;  %s287_s19 = scalar_lea.hbm %s454_s1, 256 }
  0x32   : > { %p284_p0 = scmp.ne.s32.totalorder %s122_s2, %s283_s13  ;;  %p288_p3 = scmp.lt.s32.totalorder %s122_s2, %s454_s1 }
  0x33   : > { %p289_p4 = scmp.lt.s32.totalorder %s287_s19, %s283_s13 }
  0x34   : > { %p285_p1 = pnand %p284_p0, %p385_p5 }
  0x35   : > { %p290_p7 = por %p289_p4, %p288_p3 }
  0x36   : > { %p286_p2 = pneg %p285_p1 }
  0x38   : > { %p291_p6 = pnand %p290_p7, %p286_p2 }
  0x3a   : > { %294 = shalt.err (!%p291_p6)
}
  0x3b   : > { %197 = dma.vmem_to_hbm [thread:$0]  (%p385_p5), %s415_s27, 128, %s122_s2, %s111_s3  }
  0x3c PF: > { %p209_p8 = scmp.ge.s32.totalorder %s333_s9, 2  ;;  %s136_s22 = sand.u32 1, %s321_s6  }
  0x3d   : > { %p458_p9 = scmp.ne.s32.totalorder %s456_s17, 0  ;;  %s137_s23 = scalar_lea.sflag [#allocation4], %s136_s22 }
  0x3f   : > { %p204_p10 = pnand %p209_p8, %p458_p9 }
  0x41   : > { %p205_p11 = pneg %p204_p10 }
  0x43   : > { %316 = dma.done.wait (%p205_p11), %s137_s23, 128  }
  0x44   : > { %318 = vsyncadd (%p205_p11), %s137_s23, 4294967168  ;;  %p12_p12 = scmp.ge.s32.totalorder %s372_s12, 4   ;;  %s459_s6 = smov %s325_s7 }
  0x45   : > { %s460_s7 = smov %s329_s8  ;;  %s461_s8 = smov %s383_s15 }
  0x46   : > { %s462_s9 = smov %s372_s12  ;;  %14 = sbr.rel (!%p12_p12) target bundleno = 4 (0x4), region = 61 }
  0x4b   :  { %142 = vsyncpa [#allocation3], 1 }
  0x4c   :  { %144 = vsyncpa [#allocation3 + $0x1], 1 }
  0x4d   :  { %145 = vsyncpa [#allocation4], 1 }
  0x4e   :  { %147 = vsyncpa [#allocation4 + $0x1], 1 }

// kernel: tpu_custom_call.1
= control target key start
LH: loop header
LB: loop body
LE: loop exit
PB: predicated region body
PF: predicated region fallthrough
CT: control target
= control target key end

     0   :  { %8 = vsyncpa [#allocation3], 0  ;;  %s1132_s0 = inlined_call_operand.hbm [shape: f32[32,128], index: 0, kind: input, shape index: {}]   ;;  %s1133_s1 = inlined_call_operand.hbm [shape: f32[128,512], index: 1, kind: input, shape index: {}]   ;;  %s1134_s2 = inlined_call_operand.hbm [shape: f32[1,512], index: 2, kind: input, shape index: {}]   ;;  %s1135_s3 = inlined_call_operand.hbm [shape: f32[32,512], index: 3, kind: output, shape index: {}]  }
   0x1   :  { %10 = vsyncpa [#allocation3 + $0x1], 0 }
   0x2   :  { %11 = vsyncpa [#allocation6], 0 }
   0x3   :  { %12 = vsyncpa [#allocation4], 0 }
   0x4   :  { %14 = vsyncpa [#allocation4 + $0x1], 0  ;;  %s935_s12 = smov 0   ;;  %s937_s13 = smov 0  }
   0x5   :  { %s939_s14 = smov 0   ;;  %s941_s15 = smov 0  }
   0x6   :  { %s943_s16 = smov 0   ;;  %s945_s17 = smov 0  }
   0x7 LB: > { %s625_s18 = sadd.s32 4294967295, %s902_s17   ;;  %s626_s19 = sadd.s32 4294967294, %s902_s17   ;;  %s902_s17 = sphi %s945_s17, %s20_s17   ;;  %s898_s16 = sphi %s943_s16, %s1155_s16   ;;  %s894_s15 = sphi %s941_s15, %s1154_s15   ;;  %s890_s14 = sphi %s939_s14, %s1153_s14   ;;  %s886_s13 = sphi %s937_s13, %s1152_s13   ;;  %s882_s12 = sphi %s935_s12, %s1151_s12  }
   0x8   : > { %p52_p0 = scmp.ne.s32.totalorder %s886_s13, %s882_s12  ;;  %p969_p1 = scmp.eq.s32.totalorder %s625_s18, 0 }
   0x9   : > { %p973_p2 = scmp.eq.s32.totalorder %s625_s18, 1  ;;  %p136_p3 = scmp.eq.s32.totalorder %s626_s19, 1 }
   0xa   : > { %s1139_s20 = scalar_select %p969_p1, 1, 0 }
   0xb   : > { %p979_p4 = por %p969_p1, %p52_p0  ;;  %p627_p5 = scmp.ge.s32.totalorder %s902_s17, 1 }
   0xc   : > { %p984_p6 = por %p136_p3, %p52_p0  ;;  %p143_p7 = scmp.lt.s32.totalorder %s902_s17, 3 }
   0xd   : > { %s1141_s22 = scalar_select %p979_p4, 1, 0 }
   0xe   : > { %s1142_s23 = scalar_select %p984_p6, 1, 0 }
   0xf   : > { %p989_p8 = pnand %p627_p5, %p143_p7  ;;  %s904_s25 = smov [#allocation5]  }
  0x10   : > { %s158_s26 = sshll.u32 %s904_s25, 4  ;;  %s905_s28 = smov [#allocation7]   ;;  %s159_s26 = int_to_ptr.vmem [resolvable:$true] %s158_s26 }
  0x11   : > { %p660_p9 = pneg %p989_p8  ;;  %s175_s29 = sshll.u32 %s905_s28, 4  ;;  %s176_s29 = int_to_ptr.vmem [resolvable:$true] %s175_s29 }
  0x12   : > { %s749_s30 = scalar_lea.vmem %s159_s26, 8192  ;;  %p757_p5 = scmp.lt.s32.totalorder %s159_s26, %s159_s26 }
  0x13   : > { %p998_p11 = pnand %p660_p9, %p969_p1  ;;  %p750_p13 = scmp.ne.s32.totalorder %s159_s26, %s749_s30 }
  0x14   : > { %p758_p7 = scmp.lt.s32.totalorder %s749_s30, %s749_s30 }
  0x15   : > { %p740_p12 = pneg %p998_p11 }
  0x16   : > { %p759_p10 = por %p758_p7, %p757_p5 }
  0x17   : > { %p752_p0 = pnand %p750_p13, %p740_p12 }
  0x19   : > { %p753_p3 = pneg %p752_p0 }
  0x1b   : > { %p760_p9 = pnand %p759_p10, %p753_p3 }
  0x1d   : > { %763 = shalt.err (!%p760_p9)
}
  0x1e   : > { %s906_s4 = smov 512   ;;  %s907_s5 = smov 32  }
  0x1f   : > { %663 = dma.hbm_to_vmem [thread:$0]  (!%p998_p11), %s1133_s1, 8192, %s159_s26, [#allocation6], %s906_s4, %s906_s4, %s907_s5  }
  0x20   : > { %s775_s8 = scalar_lea.vmem %s176_s29, 64  ;;  %p783_p1 = scmp.lt.s32.totalorder %s176_s29, %s176_s29 }
  0x21   : > { %p776_p6 = scmp.ne.s32.totalorder %s176_s29, %s775_s8  ;;  %p784_p4 = scmp.lt.s32.totalorder %s775_s8, %s775_s8 }
  0x23   : > { %p778_p13 = pnand %p776_p6, %p740_p12  ;;  %p785_p5 = por %p784_p4, %p783_p1 }
  0x25   : > { %p779_p0 = pneg %p778_p13 }
  0x27   : > { %p786_p10 = pnand %p785_p5, %p779_p0 }
  0x29   : > { %789 = shalt.err (!%p786_p10)
}
  0x2a   : > { %666 = dma.hbm_to_vmem [thread:$0]  (!%p998_p11), %s1134_s2, 64, %s176_s29, [#allocation6]  }
  0x2b   : > { %s29_s11 = sadd.s32 1, %s898_s16  ;;  %s39_s18 = sadd.s32 1, %s890_s14 }
  0x2c   : > { %p30_p1 = scmp.ge.s32.totalorder %s29_s11, 2  ;;  %p46_p4 = scmp.ne.s32.totalorder %s890_s14, %s886_s13 }
  0x2d   : > { %p47_p6 = scmp.eq.s32.totalorder %s902_s17, 0  ;;  %p677_p12 = scmp.lt.s32.totalorder %s902_s17, 2 }
  0x2e   : > { %s1157_s11 = smov (%p30_p1, %s29_s11), 0  ;;  %p1030_p7 = por %p973_p2, %p46_p4 }
  0x2f   : > { %p48_p3 = por %p47_p6, %p46_p4  ;;  %s36_s25 = ssub.s32 %s898_s16, %s1157_s11 }
  0x30   : > { %s186_s26 = sand.u32 1, %s890_s14   ;;  %p37_p9 = scmp.eq.s32.totalorder %s36_s25, 0 }
  0x31   : > { %s631_s27 = sshll.u32 %s186_s26, 4  ;;  %s645_s28 = sshll.u32 %s898_s16, 8 }
  0x32   : > { %s1039_s29 = scalar_select %p37_p9, %s890_s14, %s39_s18  }
  0x33   : > { %s196_s5 = scalar_lea.hbm %s1132_s0, %s645_s28  ;;  %s190_s6 = scalar_lea.vmem [#allocation2], %s631_s27 }
  0x34   : > { %s197_s7 = sshll.u32 %s190_s6, 4  ;;  %p1046_p11 = pnand %p677_p12, %p48_p3  ;;  %s198_s7 = int_to_ptr.vmem [resolvable:$true] %s197_s7 }
  0x35   : > { %s187_s8 = scalar_lea.sflag [#allocation3], %s186_s26  ;;  %s803_s9 = scalar_lea.vmem %s198_s7, 256 }
  0x36   : > { %p792_p2 = pneg %p1046_p11  ;;  %p804_p13 = scmp.ne.s32.totalorder %s198_s7, %s803_s9 }
  0x37   : > { %s908_s10 = smov [#allocation2]  }
  0x38   : > { %p806_p0 = pnand %p804_p13, %p792_p2  ;;  %s808_s18 = sshll.u32 %s908_s10, 4  ;;  %s809_s18 = int_to_ptr.vmem [resolvable:$false] %s808_s18 }
  0x39   : > { %s810_s25 = scalar_lea.vmem %s809_s18, 512  ;;  %p811_p10 = scmp.lt.s32.totalorder %s198_s7, %s809_s18 }
  0x3a   : > { %p807_p5 = pneg %p806_p0  ;;  %p812_p1 = scmp.lt.s32.totalorder %s810_s25, %s803_s9 }
  0x3c   : > { %p813_p4 = por %p812_p1, %p811_p10 }
  0x3e   : > { %p814_p6 = pnand %p813_p4, %p807_p5 }
  0x40   : > { %817 = shalt.err (!%p814_p6)
}
  0x41   : > { %s909_s27 = smov 128   ;;  %s910_s28 = smov 8  }
  0x42   : > { %670 = dma.hbm_to_vmem [thread:$0]  (!%p1046_p11), %s196_s5, 256, %s198_s7, %s187_s8, %s909_s27, %s909_s27, %s910_s28  }
  0x43   : > { %209 = sbr.rel (%p989_p8) target bundleno = 325 (0x145), region = 32  ;;  %s1057_s26 = sand.u32 (!%p989_p8), 1, %s886_s13  }
  0x44   : > { %s635_s30 = sshll.u32 (!%p989_p8), %s1057_s26, 4  ;;  %s212_s4 = scalar_lea.sflag (!%p989_p8), [#allocation3], %s1057_s26 }
  0x45   : > { %s1061_s6 = scalar_lea.vmem (!%p989_p8), [#allocation2], %s635_s30  ;;  %p1147_p12 = scmp.ne.s32.totalorder (!%p989_p8), %s1141_s22, 0 }
  0x48   : > { %869 = dma.done.wait (%p1147_p12), %s212_s4, 256  }
  0x49   : > { %871 = vsyncadd (%p1147_p12), %s212_s4, 4294967040  ;;  %p1148_p3 = scmp.ne.s32.totalorder %s1139_s20, 0 }
  0x4b   : > { %873 = dma.done.wait (%p1148_p3), [#allocation6], 8256  }
  0x4c   : > { %875 = vsyncadd (%p1148_p3), [#allocation6], 4294959040  ;;  %v911_v0 = vmov 0.0   ;;  %v314_v1 = vld [vmem:[#allocation5 + $0x1e8] sm:$0xff]  ;;  %v316_v2 = vld [vmem:[#allocation5 + $0x1f8] sm:$0xff]  ;;  %s638_s20 = sshll.u32 %s1057_s26, 6 }
  0x4d   : > { %403 = vmatprep.mubr.f32.mxu0 %v911_v0  ;;  %480 = vmatprep.mubr.f32.mxu1 %v911_v0  ;;  %v313_v3 = vld [vmem:[#allocation5 + $0x1e0] sm:$0xff]  ;;  %v315_v4 = vld [vmem:[#allocation5 + $0x1f0] sm:$0xff]  ;;  %v310_v5 = vld [vmem:[#allocation5 + $0x1c8] sm:$0xff]  ;;  %s245_s22 = scalar_lea.vmem [#allocation8], %s638_s20  ;;  %s647_s5 = sshll.u32 %s894_s15, 10 }
  0x4e   : > { %339 = vmatprep.subr.mxu0 %v314_v1  ;;  %416 = vmatprep.subr.mxu1 %v316_v2  ;;  %v312_v6 = vld [vmem:[#allocation5 + $0x1d8] sm:$0xff]  ;;  %v309_v7 = vld [vmem:[#allocation5 + $0x1c0] sm:$0xff]  ;;  %v311_v8 = vld [vmem:[#allocation5 + $0x1d0] sm:$0xff]  ;;  %s518_s24 = sshll.u32 %s245_s22, 4  ;;  %s1084_s8 = scalar_lea.hbm %s1135_s3, %s647_s5  ;;  %s1079_s24 = int_to_ptr.vmem [resolvable:$true] %s518_s24 }
  0x4f   : > { %340 = vmatpush1.msra.mxu0 %v313_v3  ;;  %417 = vmatpush1.msra.mxu1 %v315_v4  ;;  %v306_v9 = vld [vmem:[#allocation5 + $0x1a8] sm:$0xff]  ;;  %v308_v10 = vld [vmem:[#allocation5 + $0x1b8] sm:$0xff]  ;;  %v305_v11 = vld [vmem:[#allocation5 + $0x1a0] sm:$0xff]  ;;  %v319_v4 = vlaneseq  ;;  %s502_s15 = scalar_lea.sflag [#allocation4], %s1057_s26  ;;  %s818_s9 = scalar_lea.vmem %s1079_s24, 1024 }
  0x50   : > { %341 = vmatprep.subr.mxu0 %v310_v5  ;;  %418 = vmatprep.subr.mxu1 %v312_v6  ;;  %v307_v12 = vld [vmem:[#allocation5 + $0x1b0] sm:$0xff]  ;;  %v302_v13 = vld [vmem:[#allocation5 + $0x188] sm:$0xff]  ;;  %v304_v14 = vld [vmem:[#allocation5 + $0x198] sm:$0xff]  ;;  %p819_p8 = scmp.ne.s32.totalorder %s1079_s24, %s818_s9  ;;  %s912_s10 = smov [#allocation8]  }
  0x51   : > { %342 = vmatpush1.msra.mxu0 %v309_v7  ;;  %419 = vmatpush1.msra.mxu1 %v311_v8  ;;  %v301_v15 = vld [vmem:[#allocation5 + $0x180] sm:$0xff]  ;;  %v303_v16 = vld [vmem:[#allocation5 + $0x190] sm:$0xff]  ;;  %v298_v17 = vld [vmem:[#allocation5 + $0x168] sm:$0xff]  ;;  %v320_v5 = vshrl.u32 %v319_v4, 7  ;;  %s822_s18 = sshll.u32 %s912_s10, 4  ;;  %s823_s18 = int_to_ptr.vmem [resolvable:$false] %s822_s18 }
  0x52   : > { %343 = vmatprep.subr.mxu0 %v306_v9  ;;  %420 = vmatprep.subr.mxu1 %v308_v10  ;;  %v300_v18 = vld [vmem:[#allocation5 + $0x178] sm:$0xff]  ;;  %v297_v19 = vld [vmem:[#allocation5 + $0x160] sm:$0xff]  ;;  %v299_v20 = vld [vmem:[#allocation5 + $0x170] sm:$0xff]  ;;  %p820_p9 = pnand %p819_p8, %p1030_p7  ;;  %s824_s25 = scalar_lea.vmem %s823_s18, 2048 }
  0x53   : > { %344 = vmatpush1.msra.mxu0 %v305_v11  ;;  %421 = vmatpush1.msra.mxu1 %v307_v12  ;;  %v294_v21 = vld [vmem:[#allocation5 + $0x148] sm:$0xff]  ;;  %v296_v22 = vld [vmem:[#allocation5 + $0x158] sm:$0xff]  ;;  %v293_v23 = vld [vmem:[#allocation5 + $0x140] sm:$0xff]  ;;  %v321_v6 = vsub.s32 0, %v320_v5  ;;  %v329_v7 = vsub.s32 2, %v320_v5  ;;  %v325_v9 = vsub.s32 1, %v320_v5  ;;  %p825_p2 = scmp.lt.s32.totalorder %s1079_s24, %s823_s18  ;;  %p826_p13 = scmp.lt.s32.totalorder %s824_s25, %s818_s9 }
  0x54   : > { %345 = vmatprep.subr.mxu0 %v302_v13  ;;  %422 = vmatprep.subr.mxu1 %v304_v14  ;;  %v295_v24 = vld [vmem:[#allocation5 + $0x150] sm:$0xff]  ;;  %v290_v25 = vld [vmem:[#allocation5 + $0x128] sm:$0xff]  ;;  %v292_v26 = vld [vmem:[#allocation5 + $0x138] sm:$0xff]  ;;  %v333_v10 = vsub.s32 3, %v320_v5  ;;  %p821_p11 = pneg %p820_p9 }
  0x55   : > { %346 = vmatpush1.msra.mxu0 %v301_v15  ;;  %423 = vmatpush1.msra.mxu1 %v303_v16  ;;  %v289_v27 = vld [vmem:[#allocation5 + $0x120] sm:$0xff]  ;;  %v291_v28 = vld [vmem:[#allocation5 + $0x130] sm:$0xff]  ;;  %v286_v29 = vld [vmem:[#allocation5 + $0x108] sm:$0xff]  ;;  %p827_p0 = por %p826_p13, %p825_p2 }
  0x56   : > { %347 = vmatprep.subr.mxu0 %v298_v17  ;;  %424 = vmatprep.subr.mxu1 %v300_v18  ;;  %v288_v30 = vld [vmem:[#allocation5 + $0x118] sm:$0xff]  ;;  %v285_v31 = vld [vmem:[#allocation5 + $0x100] sm:$0xff]  ;;  %v287_v32 = vld [vmem:[#allocation5 + $0x110] sm:$0xff] }
  0x57   : > { %348 = vmatpush1.msra.mxu0 %v297_v19  ;;  %425 = vmatpush1.msra.mxu1 %v299_v20  ;;  %v282_v33 = vld [vmem:[#allocation5 + $0xe8] sm:$0xff]  ;;  %v284_v34 = vld [vmem:[#allocation5 + $0xf8] sm:$0xff]  ;;  %v281_v35 = vld [vmem:[#allocation5 + $0xe0] sm:$0xff]  ;;  %p828_p5 = pnand %p827_p0, %p821_p11 }
  0x58   : > { %349 = vmatprep.subr.mxu0 %v294_v21  ;;  %426 = vmatprep.subr.mxu1 %v296_v22  ;;  %v283_v36 = vld [vmem:[#allocation5 + $0xf0] sm:$0xff]  ;;  %v278_v37 = vld [vmem:[#allocation5 + $0xc8] sm:$0xff]  ;;  %v280_v38 = vld [vmem:[#allocation5 + $0xd8] sm:$0xff] }
  0x59   : > { %350 = vmatpush1.msra.mxu0 %v293_v23  ;;  %427 = vmatpush1.msra.mxu1 %v295_v24  ;;  %v277_v39 = vld [vmem:[#allocation5 + $0xc0] sm:$0xff]  ;;  %v279_v40 = vld [vmem:[#allocation5 + $0xd0] sm:$0xff]  ;;  %v274_v41 = vld [vmem:[#allocation5 + $0xa8] sm:$0xff] }
  0x5a   : > { %351 = vmatprep.subr.mxu0 %v290_v25  ;;  %428 = vmatprep.subr.mxu1 %v292_v26  ;;  %v276_v42 = vld [vmem:[#allocation5 + $0xb8] sm:$0xff]  ;;  %v273_v43 = vld [vmem:[#allocation5 + $0xa0] sm:$0xff]  ;;  %v275_v44 = vld [vmem:[#allocation5 + $0xb0] sm:$0xff] }
  0x5b   : > { %352 = vmatpush1.msra.mxu0 %v289_v27  ;;  %429 = vmatpush1.msra.mxu1 %v291_v28  ;;  %v270_v45 = vld [vmem:[#allocation5 + $0x88] sm:$0xff]  ;;  %v272_v46 = vld [vmem:[#allocation5 + $0x98] sm:$0xff]  ;;  %v269_v47 = vld [vmem:[#allocation5 + $0x80] sm:$0xff] }
  0x5c   : > { %353 = vmatprep.subr.mxu0 %v286_v29  ;;  %430 = vmatprep.subr.mxu1 %v288_v30  ;;  %v271_v48 = vld [vmem:[#allocation5 + $0x90] sm:$0xff]  ;;  %v266_v49 = vld [vmem:[#allocation5 + $0x68] sm:$0xff]  ;;  %v268_v50 = vld [vmem:[#allocation5 + $0x78] sm:$0xff] }
  0x5d   : > { %354 = vmatpush1.msra.mxu0 %v285_v31  ;;  %431 = vmatpush1.msra.mxu1 %v287_v32  ;;  %v265_v51 = vld [vmem:[#allocation5 + $0x60] sm:$0xff]  ;;  %v267_v52 = vld [vmem:[#allocation5 + $0x70] sm:$0xff]  ;;  %v262_v53 = vld [vmem:[#allocation5 + $0x48] sm:$0xff] }
  0x5e   : > { %355 = vmatprep.subr.mxu0 %v282_v33  ;;  %432 = vmatprep.subr.mxu1 %v284_v34  ;;  %v264_v54 = vld [vmem:[#allocation5 + $0x58] sm:$0xff]  ;;  %v261_v55 = vld [vmem:[#allocation5 + $0x40] sm:$0xff]  ;;  %v263_v56 = vld [vmem:[#allocation5 + $0x50] sm:$0xff] }
  0x5f   : > { %356 = vmatpush1.msra.mxu0 %v281_v35  ;;  %433 = vmatpush1.msra.mxu1 %v283_v36  ;;  %v258_v57 = vld [vmem:[#allocation5 + $0x28] sm:$0xff]  ;;  %v260_v58 = vld [vmem:[#allocation5 + $0x38] sm:$0xff]  ;;  %v257_v59 = vld [vmem:[#allocation5 + $0x20] sm:$0xff] }
  0x60   : > { %357 = vmatprep.subr.mxu0 %v278_v37  ;;  %434 = vmatprep.subr.mxu1 %v280_v38  ;;  %v259_v60 = vld [vmem:[#allocation5 + $0x30] sm:$0xff]  ;;  %v254_v61 = vld [vmem:[#allocation5 + $0x8] sm:$0xff]  ;;  %v256_v62 = vld [vmem:[#allocation5 + $0x18] sm:$0xff] }
  0x61   : > { %358 = vmatpush1.msra.mxu0 %v277_v39  ;;  %435 = vmatpush1.msra.mxu1 %v279_v40  ;;  %v253_v63 = vld [vmem:[#allocation5] sm:$0xff]  ;;  %v255_v1 = vld [vmem:[#allocation5 + $0x10] sm:$0xff]  ;;  %v252_v3 = vld [vmem:[%s1061_s6 + $0x8] sm:$0xff] }
  0x62   : > { %359 = vmatprep.subr.mxu0 %v274_v41  ;;  %436 = vmatprep.subr.mxu1 %v276_v42  ;;  %v251_v2 = vld [vmem:[%s1061_s6] sm:$0xff] }
  0x63   : > { %360 = vmatpush1.msra.mxu0 %v273_v43  ;;  %437 = vmatpush1.msra.mxu1 %v275_v44  ;;  %v317_v8 = vld [vmem:[#allocation7] sm:$0xf] }
  0x64   : > { %361 = vmatprep.subr.mxu0 %v270_v45  ;;  %438 = vmatprep.subr.mxu1 %v272_v46  ;;  %v322_v11 = vrot.slane %v317_v8, %v321_v6  ;;  %v330_v12 = vrot.slane %v317_v8, %v329_v7  ;;  %v326_v13 = vrot.slane %v317_v8, %v325_v9 }
  0x65   : > { %362 = vmatpush1.msra.mxu0 %v269_v47  ;;  %439 = vmatpush1.msra.mxu1 %v271_v48  ;;  %v334_v14 = vrot.slane %v317_v8, %v333_v10 }
  0x66   : > { %363 = vmatprep.subr.mxu0 %v266_v49  ;;  %440 = vmatprep.subr.mxu1 %v268_v50 }
  0x67   : > { %364 = vmatpush1.msra.mxu0 %v265_v51  ;;  %441 = vmatpush1.msra.mxu1 %v267_v52 }
  0x68   : > { %365 = vmatprep.subr.mxu0 %v262_v53  ;;  %442 = vmatprep.subr.mxu1 %v264_v54 }
  0x69   : > { %366 = vmatpush1.msra.mxu0 %v261_v55  ;;  %443 = vmatpush1.msra.mxu1 %v263_v56 }
  0x6a   : > { %367 = vmatprep.subr.mxu0 %v258_v57  ;;  %444 = vmatprep.subr.mxu1 %v260_v58 }
  0x6b   : > { %368 = vmatpush1.msra.mxu0 %v257_v59  ;;  %445 = vmatpush1.msra.mxu1 %v259_v60 }
  0x6c   : > { %369 = vmatprep.subr.mxu0 %v254_v61  ;;  %446 = vmatprep.subr.mxu1 %v256_v62 }
  0x6d   : > { %370 = vmatpush1.msra.mxu0 %v253_v63  ;;  %447 = vmatpush1.msra.mxu1 %v255_v1 }
  0x6e   : > { %404 = vmatmul.mubr.f32.vlgmr.msra.gmra.mxu0 %v251_v2  ;;  %481 = vmatmul.mubr.f32.vlgmr.msra.gmra.mxu1 %v251_v2 }
  0x6f   : > { %409 = vmatprep.mubr.f32.mxu0 %v911_v0  ;;  %486 = vmatprep.mubr.f32.mxu1 %v911_v0 }
  0x72   : > { %410 = vmatmul.mubr.f32.gmra.mxu0 %v252_v3  ;;  %487 = vmatmul.mubr.f32.gmra.mxu1 %v252_v3 }
 0x12e   : > { %v405_v15 = vpop.f32.mrf.mxu0  ;;  %v482_v16 = vpop.f32.mrf.mxu1 }
 0x12f   : > { %v406_v17 = vadd.f32 %v405_v15, %v322_v11  ;;  %v483_v0 = vadd.f32 %v482_v16, %v330_v12 }
 0x130   : > { %v407_v18 = vpop.f32.mrf.mxu0  ;;  %v484_v19 = vpop.f32.mrf.mxu1 }
 0x131   : > { %493 = vst [vmem:[%s245_s22] sm:$0xff] %v406_v17  ;;  %495 = vst [vmem:[%s245_s22 + $0x10] sm:$0xff] %v483_v0  ;;  %v408_v20 = vadd.f32 %v407_v18, %v326_v13  ;;  %v485_v21 = vadd.f32 %v484_v19, %v334_v14 }
 0x132   : > { %v411_v22 = vpop.f32.mrf.mxu0  ;;  %v488_v23 = vpop.f32.mrf.mxu1 }
 0x133   : > { %494 = vst [vmem:[%s245_s22 + $0x8] sm:$0xff] %v408_v20  ;;  %496 = vst [vmem:[%s245_s22 + $0x18] sm:$0xff] %v485_v21  ;;  %v412_v24 = vadd.f32 %v411_v22, %v322_v11  ;;  %v489_v25 = vadd.f32 %v488_v23, %v330_v12 }
 0x134   : > { %v413_v26 = vpop.f32.mrf.mxu0  ;;  %v490_v27 = vpop.f32.mrf.mxu1 }
 0x135   : > { %497 = vst [vmem:[%s245_s22 + $0x20] sm:$0xff] %v412_v24  ;;  %499 = vst [vmem:[%s245_s22 + $0x30] sm:$0xff] %v489_v25  ;;  %v414_v28 = vadd.f32 %v413_v26, %v326_v13  ;;  %v491_v29 = vadd.f32 %v490_v27, %v334_v14 }
 0x137   : > { %498 = vst [vmem:[%s245_s22 + $0x28] sm:$0xff] %v414_v28  ;;  %500 = vst [vmem:[%s245_s22 + $0x38] sm:$0xff] %v491_v29 }
 0x138   : > { %831 = shalt.err (!%p828_p5)
}
 0x139   : > { %s832_s27 = scalar_lea.hbm %s1084_s8, 1024  ;;  %s836_s4 = scalar_lea.hbm %s1135_s3, 2048 }
 0x13a   : > { %p833_p10 = scmp.ne.s32.totalorder %s1084_s8, %s832_s27  ;;  %p837_p6 = scmp.lt.s32.totalorder %s1084_s8, %s1135_s3 }
 0x13b   : > { %p838_p12 = scmp.lt.s32.totalorder %s836_s4, %s832_s27 }
 0x13c   : > { %p834_p1 = pnand %p833_p10, %p1030_p7 }
 0x13d   : > { %p839_p3 = por %p838_p12, %p837_p6 }
 0x13e   : > { %p835_p4 = pneg %p834_p1 }
 0x140   : > { %p840_p8 = pnand %p839_p3, %p835_p4 }
 0x142   : > { %843 = shalt.err (!%p840_p8)
}
 0x143   : > { %s913_s22 = smov 512   ;;  %s914_s5 = smov 32  }
 0x144   : > { %658 = dma.vmem_to_hbm [thread:$0]  (%p1030_p7), %s1079_s24, 1024, %s1084_s8, %s502_s15, %s913_s22, %s913_s22, %s914_s5  }
 0x145 PF: > { %s533_s7 = sand.u32 1, %s882_s12   ;;  %p1149_p9 = scmp.ne.s32.totalorder %s1142_s23, 0 }
 0x146   : > { %p1150_p11 = scmp.ge.s32.totalorder %s902_s17, 2  ;;  %s534_s21 = scalar_lea.sflag [#allocation4], %s533_s7 }
 0x148   : > { %p672_p2 = pnand %p1150_p11, %p1149_p9 }
 0x14a   : > { %p673_p13 = pneg %p672_p2 }
 0x14c   : > { %877 = dma.done.wait (%p673_p13), %s534_s21, 1024  }
 0x14d   : > { %879 = vsyncadd (%p673_p13), %s534_s21, 4294966272  ;;  %s20_s17 = sadd.s32 1, %s902_s17   ;;  %s1151_s12 = smov %s886_s13 }
 0x14e   : > { %p17_p0 = scmp.ge.s32.totalorder %s20_s17, 4   ;;  %s1152_s13 = smov %s890_s14 }
 0x14f   : > { %s1153_s14 = smov %s1039_s29  ;;  %s1154_s15 = smov %s898_s16 }
 0x150   : > { %s1155_s16 = smov %s1157_s11  ;;  %19 = sbr.rel (!%p17_p0) target bundleno = 7 (0x7), region = 87 }
 0x155   :  { %539 = vsyncpa [#allocation3], 1 }
 0x156   :  { %541 = vsyncpa [#allocation3 + $0x1], 1 }
 0x157   :  { %542 = vsyncpa [#allocation6], 1 }
 0x158   :  { %543 = vsyncpa [#allocation4], 1 }
 0x159   :  { %545 = vsyncpa [#allocation4 + $0x1], 1 }

</bundles_post_ra>
